<compile_context>
chip_gen: v5e
topology: v5e:2x2
jax: 0.10.0
libtpu: 0.0.40
codegen_flags: <defaults>
</compile_context>

<pallas_src>
import functools

import jax
import jax.numpy as jnp
from jax import lax
from jax.experimental import pallas as pl
from jax.experimental.pallas import tpu as pltpu

_MIB = 1024 * 1024


def _l_color_kernel(x_ref, o_ref, acc_ref, *, inv_hw, th, h_total, need_mask):
    # x_ref block: (BT, 3, TH, W); acc_ref scratch: (BT, 3) f32; o_ref: (BT, 1, 1, 1)
    hi = pl.program_id(1)

    @pl.when(hi == 0)
    def _init():
        acc_ref[...] = jnp.zeros_like(acc_ref)

    x = x_ref[...].astype(jnp.float32)                  # (BT, 3, TH, W)
    if need_mask:
        # Remainder tile: zero-out rows >= H before reducing (padded region is garbage).
        row = lax.broadcasted_iota(jnp.int32, x.shape, 2)
        valid = (hi * th + row) < h_total
        x = jnp.where(valid, x, 0.0)

    # Sublane (row) reduction first (VPU-friendly), then one cross-lane reduction over W.
    partial = jnp.sum(jnp.sum(x, axis=2), axis=-1)      # (BT, 3)
    acc_ref[...] += partial

    @pl.when(hi == pl.num_programs(1) - 1)
    def _finalize():
        mean = acc_ref[...] * inv_hw                    # (BT, 3) spatial means per channel
        mr = mean[:, 0:1]
        mg = mean[:, 1:2]
        mb = mean[:, 2:3]
        drg = (mr - mg) ** 2
        drb = (mr - mb) ** 2
        dgb = (mb - mg) ** 2
        k = jnp.sqrt(drg * drg + drb * drb + dgb * dgb)  # (BT, 1)
        o_ref[...] = k.reshape(o_ref.shape).astype(o_ref.dtype)


def _round_up(n, m):
    return ((n + m - 1) // m) * m


def _largest_divisor_at_most(n, cap, multiple_of=1):
    """Largest d with d | n, d <= cap, d % multiple_of == 0. None if none exists."""
    best = None
    for d in range(1, n + 1):
        if d > cap:
            break
        if n % d == 0 and d % multiple_of == 0:
            best = d
    return best


def _choose_th(h, cap, pack):
    """Pick an H-tile: prefer an exact divisor (no masking) unless the masked
    ceil-div tiling gives strictly fewer grid steps."""
    cap = max(pack, (cap // pack) * pack)
    thb = min(cap, _round_up(h, pack))          # pack-multiple tile, masked remainder
    steps_b = -(-h // thb)
    div = _largest_divisor_at_most(h, cap, multiple_of=pack)
    if div is not None and (h // div) <= steps_b:
        return div, False
    return thb, (h % thb) != 0


def l_color(x, *, target_block_bytes=None):
    """Pallas implementation of L_color.forward. x: (B, 3, H, W) -> (B, 1, 1, 1)."""
    b, c, h, w = x.shape
    assert c == 3, "L_color expects 3 channels (RGB)"
    itemsize = jnp.dtype(x.dtype).itemsize
    # Dtype-aware sublane packing: 8 rows (f32), 16 (bf16/f16), 32 (int8/fp8).
    pack = 8 * max(1, 4 // itemsize)

    try:
        physical_vmem = int(pltpu.get_tpu_info().vmem_capacity_bytes)
    except Exception:
        physical_vmem = 64 * _MIB  # conservative (v7x per-TC)

    if target_block_bytes is None:
        # ~12 MiB on all current generations (64 MiB v7x -> 12.8, 128 MiB v5e/v6e -> 12).
        target_block_bytes = min(12 * _MIB, physical_vmem // 5)
    target_block_bytes = max(int(target_block_bytes), c * pack * 128 * itemsize)

    # Layout-padded sizes: W rounds up to 128 lanes, rows to the sublane pack.
    padded_w = _round_up(w, 128)
    row_bytes = c * padded_w * itemsize                  # one padded image row, all channels
    plane_bytes = _round_up(h, pack) * row_bytes         # one padded image

    need_mask = False
    if plane_bytes <= target_block_bytes:
        # Small images: keep the full plane, fold several images per step to amortize
        # per-step overhead, but keep the parallel batch axis >= 2 so both v7x TCs stream.
        th = h
        bt_cap = max(1, target_block_bytes // plane_bytes)
        if b >= 2:
            bt_cap = min(bt_cap, b // 2)
        bt = _largest_divisor_at_most(b, bt_cap) or 1
    else:
        # Large images: tile the spatial reduction; masked remainder tile for awkward H.
        bt = 1
        th_cap = max(pack, target_block_bytes // row_bytes)
        th, need_mask = _choose_th(h, th_cap, pack)
        # TODO(synk): for b == 1 on v7x, additionally split the H reduction over a leading
        # parallel axis of 2 (partial sums + tiny epilogue) so both TensorCores stream HBM.

    n_bt = b // bt
    n_ht = -(-h // th)

    block_bytes = bt * c * _round_up(th, pack) * padded_w * itemsize
    # Deep (3x) buffering only pays off when blocks are small and the axis is tiled;
    # large blocks stay at the default double-buffering to keep VMEM bounded.
    n_buffers = 3 if (block_bytes <= 5 * _MIB and n_ht >= 3) else 2
    in_spec_kwargs = {}
    if n_buffers != 2 and n_ht >= 2:
        in_spec_kwargs["pipeline_mode"] = pl.Buffered(n_buffers)

    budget = n_buffers * block_bytes + 2 * _MIB          # buffers + output/scratch/misc
    vmem_limit = int(min(max(32 * _MIB, budget), (physical_vmem * 3) // 4))

    kernel = functools.partial(
        _l_color_kernel,
        inv_hw=float(1.0 / (h * w)),
        th=int(th),
        h_total=int(h),
        need_mask=bool(need_mask),
    )

    cost = pl.CostEstimate(
        flops=int(x.size + 16 * b),
        transcendentals=int(b),
        bytes_accessed=int(x.size * itemsize + 4 * b),
    )

    return pl.pallas_call(
        kernel,
        out_shape=jax.ShapeDtypeStruct((b, 1, 1, 1), jnp.float32),
        grid_spec=pltpu.PrefetchScalarGridSpec(
            num_scalar_prefetch=0,
            grid=(n_bt, n_ht),                            # batch leading, reduction last
            in_specs=[
                pl.BlockSpec(
                    (bt, c, th, w),
                    lambda bi, hi: (bi, 0, hi, 0),
                    **in_spec_kwargs,
                ),
            ],
            out_specs=pl.BlockSpec((bt, 1, 1, 1), lambda bi, hi: (bi, 0, 0, 0)),
            scratch_shapes=[pltpu.VMEM((bt, c), jnp.float32)],
        ),
        compiler_params=pltpu.CompilerParams(
            dimension_semantics=("parallel", "arbitrary"),
            vmem_limit_bytes=vmem_limit,
        ),
        cost_estimate=cost,
    )(x)


def l_color_ref(x):
    """Pure-JAX reference mirroring the PyTorch forward, for verification."""
    mean_rgb = jnp.mean(x.astype(jnp.float32), axis=(2, 3), keepdims=True)  # (B,3,1,1)
    mr = mean_rgb[:, 0:1]
    mg = mean_rgb[:, 1:2]
    mb = mean_rgb[:, 2:3]
    drg = (mr - mg) ** 2
    drb = (mr - mb) ** 2
    dgb = (mb - mg) ** 2
    return jnp.sqrt(drg ** 2 + drb ** 2 + dgb ** 2)                          # (B,1,1,1)


if __name__ == "__main__":
    key = jax.random.PRNGKey(0)
    k1, k2, k3 = jax.random.split(key, 3)

    # 1) Small shape consistent with the module: batch=2, 3 RGB channels, 16x16.
    #    Full-plane blocks, batch axis stays parallel with extent 2.
    x = jax.random.uniform(k1, (2, 3, 16, 16), dtype=jnp.float32)
    out = jax.block_until_ready(l_color(x))
    ref = l_color_ref(x)
    assert out.shape == (2, 1, 1, 1), out.shape
    assert jnp.allclose(out, ref, atol=1e-5, rtol=1e-5), (out, ref)

    # 2) Exercise the spatially-tiled + deeper-buffered path by forcing a tiny block
    #    budget: (2, 3, 32, 128) -> TH=8, 4 h-tiles, Buffered(3).
    x2 = jax.random.uniform(k2, (2, 3, 32, 128), dtype=jnp.float32)
    out2 = jax.block_until_ready(l_color(x2, target_block_bytes=16 * 1024))
    ref2 = l_color_ref(x2)
    assert out2.shape == (2, 1, 1, 1), out2.shape
    assert jnp.allclose(out2, ref2, atol=1e-5, rtol=1e-5), (out2, ref2)

    # 3) Exercise the masked remainder-tile path: H=36 has no multiple-of-8 divisor,
    #    so grid = ceil(36/8)=5 with the last tile masked.
    x3 = jax.random.uniform(k3, (2, 3, 36, 128), dtype=jnp.float32)
    out3 = jax.block_until_ready(l_color(x3, target_block_bytes=16 * 1024))
    ref3 = l_color_ref(x3)
    assert out3.shape == (2, 1, 1, 1), out3.shape
    assert jnp.allclose(out3, ref3, atol=1e-5, rtol=1e-5), (out3, ref3)

    print("KERNEL_OK")
</pallas_src>

<mosaic_0001>
module attributes {stable_mosaic.version = 11 : i64} {
  func.func @_l_color_kernel(%arg0: i32, %arg1: i32, %arg2: memref<1x3x16x16xf32, #tpu.memory_space<vmem>>, %arg3: memref<1x1x1x1xf32, #tpu.memory_space<vmem>>, %arg4: memref<1x3xf32, #tpu.memory_space<vmem>>) attributes {dimension_semantics = [#tpu.dimension_semantics<parallel>, #tpu.dimension_semantics<arbitrary>], iteration_bounds = array<i64: 2, 1>, scalar_prefetch = 0 : i64, scratch_operands = 1 : i64, tpu.core_type = #tpu.core_type<tc>, window_params = [{transform_indices = @transform_0, window_bounds = array<i64: 1, 3, 16, 16>}, {transform_indices = @transform_1, window_bounds = array<i64: 1, 1, 1, 1>}]} {
    %c0_i32 = arith.constant 0 : i32
    %0 = arith.cmpi eq, %arg1, %c0_i32 : i32
    %1 = arith.extui %0 : i1 to i32
    %c0_i32_0 = arith.constant 0 : i32
    %2 = arith.cmpi ne, %1, %c0_i32_0 : i32
    scf.if %2 {
      %cst_11 = arith.constant 0.000000e+00 : f32
      %12 = vector.broadcast %cst_11 : f32 to vector<1x3xf32>
      %c0_12 = arith.constant 0 : index
      %c0_13 = arith.constant 0 : index
      %13 = vector.load %arg4[%c0_12, %c0_13] : memref<1x3xf32, #tpu.memory_space<vmem>>, vector<1x3xf32>
      tpu.vector_store %arg4[%c0_12, %c0_13], %12 {strides = array<i32>} : memref<1x3xf32, #tpu.memory_space<vmem>>, vector<1x3xf32>,
    } else {
    }
    %c0 = arith.constant 0 : index
    %c0_1 = arith.constant 0 : index
    %c0_2 = arith.constant 0 : index
    %c0_3 = arith.constant 0 : index
    %3 = vector.load %arg2[%c0, %c0_1, %c0_2, %c0_3] : memref<1x3x16x16xf32, #tpu.memory_space<vmem>>, vector<1x3x16x16xf32>
    %cst = arith.constant dense<0.000000e+00> : vector<1x3x16xf32>
    %4 = vector.multi_reduction <add>, %3, %cst [2] : vector<1x3x16x16xf32> to vector<1x3x16xf32>
    %cst_4 = arith.constant dense<0.000000e+00> : vector<1x3xf32>
    %5 = vector.multi_reduction <add>, %4, %cst_4 [2] : vector<1x3x16xf32> to vector<1x3xf32>
    %c0_5 = arith.constant 0 : index
    %c0_6 = arith.constant 0 : index
    %6 = vector.load %arg4[%c0_5, %c0_6] : memref<1x3xf32, #tpu.memory_space<vmem>>, vector<1x3xf32>
    %7 = arith.addf %6, %5 : vector<1x3xf32>
    %c0_7 = arith.constant 0 : index
    %c0_8 = arith.constant 0 : index
    %8 = vector.load %arg4[%c0_7, %c0_8] : memref<1x3xf32, #tpu.memory_space<vmem>>, vector<1x3xf32>
    tpu.vector_store %arg4[%c0_7, %c0_8], %7 {strides = array<i32>} : memref<1x3xf32, #tpu.memory_space<vmem>>, vector<1x3xf32>,
    %c0_i32_9 = arith.constant 0 : i32
    %9 = arith.cmpi eq, %arg1, %c0_i32_9 : i32
    %10 = arith.extui %9 : i1 to i32
    %c0_i32_10 = arith.constant 0 : i32
    %11 = arith.cmpi ne, %10, %c0_i32_10 : i32
    scf.if %11 {
      %c0_11 = arith.constant 0 : index
      %c0_12 = arith.constant 0 : index
      %12 = vector.load %arg4[%c0_11, %c0_12] : memref<1x3xf32, #tpu.memory_space<vmem>>, vector<1x3xf32>
      %cst_13 = arith.constant 3.906250e-03 : f32
      %13 = vector.broadcast %cst_13 : f32 to vector<1x3xf32>
      %14 = arith.mulf %12, %13 : vector<1x3xf32>
      %15 = vector.extract_strided_slice %14 {offsets = [0, 0], sizes = [1, 1], strides = [1, 1]} : vector<1x3xf32> to vector<1x1xf32>
      %16 = vector.extract_strided_slice %14 {offsets = [0, 1], sizes = [1, 1], strides = [1, 1]} : vector<1x3xf32> to vector<1x1xf32>
      %17 = vector.extract_strided_slice %14 {offsets = [0, 2], sizes = [1, 1], strides = [1, 1]} : vector<1x3xf32> to vector<1x1xf32>
      %18 = arith.subf %15, %16 : vector<1x1xf32>
      %19 = arith.mulf %18, %18 : vector<1x1xf32>
      %20 = arith.subf %15, %17 : vector<1x1xf32>
      %21 = arith.mulf %20, %20 : vector<1x1xf32>
      %22 = arith.subf %17, %16 : vector<1x1xf32>
      %23 = arith.mulf %22, %22 : vector<1x1xf32>
      %24 = arith.mulf %19, %19 : vector<1x1xf32>
      %25 = arith.mulf %21, %21 : vector<1x1xf32>
      %26 = arith.addf %24, %25 : vector<1x1xf32>
      %27 = arith.mulf %23, %23 : vector<1x1xf32>
      %28 = arith.addf %26, %27 : vector<1x1xf32>
      %29 = math.sqrt %28 : vector<1x1xf32>
      %30 = vector.shape_cast %29 : vector<1x1xf32> to vector<1x1x1x1xf32>
      %c0_14 = arith.constant 0 : index
      %c0_15 = arith.constant 0 : index
      %c0_16 = arith.constant 0 : index
      %c0_17 = arith.constant 0 : index
      %31 = vector.load %arg3[%c0_14, %c0_15, %c0_16, %c0_17] : memref<1x1x1x1xf32, #tpu.memory_space<vmem>>, vector<1x1x1x1xf32>
      tpu.vector_store %arg3[%c0_14, %c0_15, %c0_16, %c0_17], %30 {strides = array<i32>} : memref<1x1x1x1xf32, #tpu.memory_space<vmem>>, vector<1x1x1x1xf32>,
    } else {
    }
    return
  }
  func.func @transform_0(%arg0: i32, %arg1: i32) -> (i32, i32, i32, i32) {
    %c0_i32 = arith.constant 0 : i32
    %c0_i32_0 = arith.constant 0 : i32
    %c0_i32_1 = arith.constant 0 : i32
    return %arg0, %c0_i32, %arg1, %c0_i32_0 : i32, i32, i32, i32
  }
  func.func @transform_1(%arg0: i32, %arg1: i32) -> (i32, i32, i32, i32) {
    %c0_i32 = arith.constant 0 : i32
    %c0_i32_0 = arith.constant 0 : i32
    %c0_i32_1 = arith.constant 0 : i32
    %c0_i32_2 = arith.constant 0 : i32
    return %arg0, %c0_i32, %c0_i32_0, %c0_i32_1 : i32, i32, i32, i32
  }
}

</mosaic_0001>

<bundles_post_ra>
// kernel: tpu_custom_call.1
= control target key start
LH: loop header
LB: loop body
LE: loop exit
PB: predicated region body
PF: predicated region fallthrough
CT: control target
= control target key end

     0   :  { %6 = vsyncpa [#allocation4], 0  ;;  %s598_s0 = inlined_call_operand.hbm [shape: f32[2,3,16,16], index: 0, kind: input, shape index: {}]   ;;  %s599_s1 = inlined_call_operand.vmem [shape: f32[2,1,1,1], index: 1, kind: output, shape index: {}]  }
   0x1   :  { %8 = vsyncpa [#allocation4 + $0x1], 0  ;;  %s514_s6 = smov 0   ;;  %s516_s7 = smov 0  }
   0x2   :  { %s518_s8 = smov 0   ;;  %s520_s9 = smov 0  }
   0x3   :  { %s522_s10 = smov 0   ;;  %s524_s11 = smov 0  }
   0x4 LB: > { %s339_s12 = sadd.s32 4294967295, %s495_s11   ;;  %s26_s13 = sadd.s32 1, %s491_s10  ;;  %s495_s11 = sphi %s524_s11, %s14_s11   ;;  %s491_s10 = sphi %s522_s10, %s605_s10   ;;  %s487_s9 = sphi %s520_s9, %s604_s9   ;;  %s483_s8 = sphi %s518_s8, %s603_s8   ;;  %s479_s7 = sphi %s516_s7, %s602_s7   ;;  %s475_s6 = sphi %s514_s6, %s601_s6  }
   0x5   : > { %p28_p0 = scmp.ge.s32.totalorder %s26_s13, 2  ;;  %s35_s14 = sadd.s32 1, %s483_s8 }
   0x6   : > { %p42_p1 = scmp.ne.s32.totalorder %s483_s8, %s479_s7  ;;  %p43_p2 = scmp.eq.s32.totalorder %s495_s11, 0 }
   0x7   : > { %s607_s13 = smov (%p28_p0, %s26_s13), 0  ;;  %p48_p4 = scmp.ne.s32.totalorder %s479_s7, %s475_s6 }
   0x8   : > { %p44_p3 = por %p43_p2, %p42_p1  ;;  %s30_s15 = ssub.s32 %s491_s10, %s607_s13 }
   0x9   : > { %p49_p5 = scmp.eq.s32.totalorder %s339_s12, 0  ;;  %p33_p6 = scmp.eq.s32.totalorder %s30_s15, 0 }
   0xa   : > { %p356_p8 = scmp.lt.s32.totalorder %s495_s11, 2  ;;  %s98_s18 = sand.u32 1, %s483_s8  }
   0xb   : > { %p553_p7 = por %p49_p5, %p48_p4  ;;  %s348_s19 = smul.u32 48, %s491_s10 }
   0xc   : > { %s559_s17 = scalar_select %p33_p6, %s483_s8, %s35_s14  }
   0xd   : > { %s347_s20 = smul.u32 48, %s98_s18  ;;  %s109_s23 = scalar_lea.hbm %s598_s0, %s348_s19 }
   0xe   : > { %p353_p9 = pnand %p356_p8, %p44_p3  ;;  %s110_s24 = sshll.u32 %s109_s23, 4  ;;  %s111_s24 = int_to_ptr.hbm [resolvable:$true] %s110_s24 }
   0xf   : > { %s102_s25 = scalar_lea.vmem [#allocation3], %s347_s20  ;;  %s99_s27 = scalar_lea.sflag [#allocation4], %s98_s18 }
  0x10   : > { %s112_s26 = sshll.u32 %s102_s25, 4  ;;  %s497_s28 = smov 128   ;;  %s113_s26 = int_to_ptr.vmem [resolvable:$true] %s112_s26 }
  0x11   : > { %s498_s29 = smov 8   ;;  %p344_p10 = scmp.ge.s32.totalorder %s495_s11, 1 }
  0x12   : > { %355 = dma.hbm_to_vmem [thread:$0]  (!%p353_p9), %s111_s24, 768, %s113_s26, %s99_s27, %s497_s28, %s497_s28, %s498_s29  }
  0x13   : > { %p120_p11 = scmp.lt.s32.totalorder %s495_s11, 3 }
  0x15   : > { %p121_p12 = pnand %p344_p10, %p120_p11 }
  0x16   : > { %s126_s30 = sand.u32 (!%p121_p12), 1, %s479_s7  }
  0x17   : > { %124 = sbr.rel (%p121_p12) target bundleno = 542 (0x21e), region = 24  ;;  %s127_s3 = scalar_lea.sflag (!%p121_p12), [#allocation4], %s126_s30 }
  0x18   : > { %s349_s2 = smul.u32 (!%p121_p12), 48, %s126_s30 }
  0x1a   : > { %s130_s4 = scalar_lea.vmem (!%p121_p12), [#allocation3], %s349_s2 }
  0x1c   : > { %470 = dma.done.wait (%p553_p7), %s127_s3, 768  }
  0x1d   : > { %472 = vsyncadd (%p553_p7), %s127_s3, 4294966528  ;;  %vm164_vm0 = vcmask 130048   ;;  %v158_v0 = vld [vmem:[%s130_s4] sm:$0xff]  ;;  %v159_v1 = vld [vmem:[%s130_s4 + $0x8] sm:$0xff]  ;;  %vm195_vm1 = vcmask 1041409   ;;  %vm197_vm2 = vcmask 1042434   ;;  %v218_v43 = vlaneseq }
  0x1e   : > { %v160_v2 = vld [vmem:[%s130_s4 + $0x10] sm:$0xff]  ;;  %v161_v3 = vld [vmem:[%s130_s4 + $0x18] sm:$0xff]  ;;  %v162_v4 = vld [vmem:[%s130_s4 + $0x20] sm:$0xff]  ;;  %v165_v6 = vsel %vm164_vm0, %v158_v0, 0.0  ;;  %v166_v7 = vsel %vm164_vm0, %v159_v1, 0.0  ;;  %vm200_vm3 = vcmask 124928  }
  0x1f   : > { %v163_v5 = vld [vmem:[%s130_s4 + $0x28] sm:$0xff]  ;;  %v174_v8 = vsel %vm164_vm0, %v160_v2, 0.0  ;;  %v167_v9 = vadd.f32 %v166_v7, %v165_v6  ;;  %v175_v10 = vsel %vm164_vm0, %v161_v3, 0.0  ;;  %v183_v11 = vsel %vm164_vm0, %v162_v4, 0.0  ;;  %s501_s5 = smov 126   ;;  %s502_s6 = smov 1  }
  0x20   : > { %v184_v12 = vsel %vm164_vm0, %v163_v5, 0.0  ;;  %v176_v13 = vadd.f32 %v175_v10, %v174_v8  ;;  %v499_v36 = vmov 0   ;;  %vm156_vm4 = vcmask 16384   ;;  %s503_s12 = smov 127   ;;  %p149_p13 = scmp.lt.s32.totalorder %s487_s9, 1 }
  0x21   : > { %v185_v14 = vadd.f32 %v184_v12, %v183_v11  ;;  %v168_v15 = vrot.slane %v167_v9, 4  ;;  %412 = vset.pattern.permute.xlu0 %v499_v36  ;;  %v500_v37 = vmov 0.0   ;;  %v219_v44 = vand.u32 127, %v218_v43 }
  0x22   : > { %v177_v16 = vrot.slane %v176_v13, 4  ;;  %157 = vst.msk [vmem:[#allocation2] sm:$0x1] %vm156_vm4, %v500_v37  ;;  %s609_s9 = smov (!%p149_p13, %s487_s9), 1  ;;  %vm267_vm5 = vcmask 0  }
  0x23   : > { %v186_v17 = vrot.slane %v185_v14, 4  ;;  %v169_v18 = vadd.f32 %v168_v15, %v167_v9  ;;  %s151_s16 = scalar_lea.vmem %s599_s1, %s609_s9 }
  0x24   : > { %v178_v19 = vadd.f32 %v177_v16, %v176_v13 }
  0x25   : > { %v187_v20 = vadd.f32 %v186_v17, %v185_v14  ;;  %v170_v21 = vrot.slane %v169_v18, 2 }
  0x26   : > { %v179_v22 = vrot.slane %v178_v19, 2 }
  0x27   : > { %v188_v23 = vrot.slane %v187_v20, 2  ;;  %v171_v24 = vadd.f32 %v170_v21, %v169_v18 }
  0x28   : > { %v180_v25 = vadd.f32 %v179_v22, %v178_v19 }
  0x29   : > { %v189_v26 = vadd.f32 %v188_v23, %v187_v20  ;;  %v172_v27 = vrot.slane %v171_v24, 1  ;;  %v204_v46 = vld [vmem:[#allocation2] sm:$0x1] }
  0x2a   : > { %v181_v28 = vrot.slane %v180_v25, 1 }
  0x2b   : > { %v190_v29 = vrot.slane %v189_v26, 1  ;;  %v173_v30 = vadd.f32 %v172_v27, %v171_v24 }
  0x2c   : > { %v182_v31 = vadd.f32 %v181_v28, %v180_v25 }
  0x2d   : > { %v191_v32 = vadd.f32 %v190_v29, %v189_v26 }
  0x2e   : > { %v196_v33 = vsel %vm195_vm1, %v182_v31, %v173_v30 }
  0x2f   : > { %v198_v34 = vsel %vm197_vm2, %v191_v32, %v196_v33 }
  0x30   : > { %v201_v35 = vsel %vm200_vm3, %v198_v34, 0.0 }
  0x31   : > { %202 = vadd.xlane.f32.xlu0 %v201_v35 }
  0xa4   : > { %v203_v38 = vpop.xlane.xlu0 %202 }
  0xa5   : > { %v206_v39 = vperm.slane %v203_v38, 0  ;;  %v207_v40 = vperm.slane %v203_v38, 1  ;;  %v208_v41 = vperm.slane %v203_v38, 2 }
  0xa7   : > { %209 = vst [vmem:[#allocation1] ss:$9 sm:$0xff] %v206_v39 }
  0xa8   : > { %211 = vst [vmem:[#allocation1 + $0x1] ss:$9 sm:$0xff] %v207_v40 }
  0xa9   : > { %213 = vst [vmem:[#allocation1 + $0x2] ss:$9 sm:$0xff] %v208_v41 }
  0xb0   : > { %v214_v42 = vld [vmem:[#allocation1] sm:$0xff] }
  0xb1   : > { %216 = vperm.xlu0 %412, %v214_v42  }
 0x123   : > { %v217_v45 = vpop.permute.xlu0 %216 }
 0x124   : > { %v220_v47 = vperm.slane %v217_v45, %v219_v44 }
 0x126   : > { %v222_v48 = vadd.f32 %v220_v47, %v204_v46 }
 0x128   : > { %224 = vst.msk [vmem:[#allocation2] sm:$0x1] %vm156_vm4, %v222_v48 }
 0x12f   : > { %v228_v49 = vld [vmem:[#allocation2] sm:$0x1] }
 0x130   : > { %v229_v50 = vmul.f32 0.00390625, %v228_v49 }
 0x132   : > { %236 = vrot.lane.b32.xlu2 %v229_v50, %s501_s5  ;;  %241 = vrot.lane.b32.xlu1 %v229_v50, %s502_s6 }
 0x13a   : > { %231 = vrot.lane.b32.xlu1 %v229_v50, %s503_s12 }
 0x18c   : > { %v237_v56 = vpop.permute.xlu2 %236 }
 0x18d   : > { %v239_v58 = vsub.f32 %v229_v50, %v237_v56 }
 0x18f   : > { %v240_v60 = vmul.f32 %v239_v58, %v239_v58 }
 0x191   : > { %v247_v62 = vmul.f32 %v240_v60, %v240_v60 }
 0x1a4   : > { %v242_v51 = vpop.permute.xlu1 %241 }
 0x1a5   : > { %v244_v52 = vsub.f32 %v229_v50, %v242_v51 }
 0x1a7   : > { %v245_v53 = vmul.f32 %v244_v52, %v244_v52 }
 0x1a9   : > { %v249_v54 = vmul.f32 %v245_v53, %v245_v53 }
 0x1ab   : > { %251 = vrot.lane.b32.xlu2 %v249_v54, %s501_s5 }
 0x1ac   : > { %v232_v55 = vpop.permute.xlu1 %231 }
 0x1ad   : > { %v234_v57 = vsub.f32 %v229_v50, %v232_v55 }
 0x1af   : > { %v235_v59 = vmul.f32 %v234_v57, %v234_v57 }
 0x1b1   : > { %v246_v61 = vmul.f32 %v235_v59, %v235_v59 }
 0x1b3   : > { %v248_v63 = vadd.f32 %v247_v62, %v246_v61 }
 0x205   : > { %v252_v0 = vpop.permute.xlu2 %251 }
 0x206   : > { %v254_v1 = vadd.f32 %v252_v0, %v248_v63 }
 0x208   : > { %413 = vrsqrt.f32 %v254_v1  ;;  %vm262_vm6 = vcmp.eq.f32.partialorder %v254_v1, inf  ;;  %v265_v9 = vand.u32 2147483648, %v254_v1  ;;  %vm264_vm7 = vcmp.eq.f32.partialorder %v254_v1, 0.0 }
 0x20e   : > { %v414_v2 = vpop.eup %413 }
 0x20f   : > { %v256_v3 = vmul.f32 %v414_v2, %v254_v1 }
 0x211   : > { %v257_v4 = vmul.f32 %v414_v2, %v256_v3 }
 0x213   : > { %v258_v5 = vmul.f32 0.5, %v257_v4 }
 0x215   : > { %v259_v6 = vsub.f32 1.5, %v258_v5 }
 0x217   : > { %v260_v7 = vmul.f32 %v414_v2, %v259_v6 }
 0x219   : > { %v261_v8 = vmul.f32 %v260_v7, %v254_v1 }
 0x21b   : > { %v263_v10 = vsel %vm262_vm6, %v254_v1, %v261_v8 }
 0x21c   : > { %v266_v11 = vsel %vm264_vm7, %v265_v9, %v263_v10 }
 0x21d   : > { %268 = vst.msk [vmem:[%s151_s16] sm:$0x1] %vm267_vm5, %v266_v11 }
 0x21e PF: > { %s14_s11 = sadd.s32 1, %s495_s11   ;;  %s601_s6 = smov %s479_s7 }
 0x21f   : > { %p11_p0 = scmp.ge.s32.totalorder %s14_s11, 4   ;;  %s602_s7 = smov %s483_s8 }
 0x220   : > { %s603_s8 = smov %s559_s17  ;;  %s604_s9 = smov %s491_s10 }
 0x221   : > { %s605_s10 = smov %s607_s13  ;;  %13 = sbr.rel (!%p11_p0) target bundleno = 4 (0x4), region = 74 }
 0x226   :  { %286 = vsyncpa [#allocation4], 1 }
 0x227   :  { %288 = vsyncpa [#allocation4 + $0x1], 1 }

</bundles_post_ra>
